<compile_context>
chip_gen: v7x
topology: tpu7x:2x2x1
jax: 0.10.0
libtpu: 0.0.40
codegen_flags: <defaults>
</compile_context>

<pallas_src>
import functools

import jax
import jax.numpy as jnp
from jax.experimental import pallas as pl
from jax.experimental.pallas import tpu as pltpu

EMB_DIM = 50      # embedding_dim from the reference module
E_PAD = 128       # embedding dim zero-padded to a full lane group
CONV_OUT = 64     # conv1 out_channels
KSIZE = 3         # conv1 kernel_size


def _cnn_kernel(x_ref, cw_ref, cb_ref, w1_ref, b1_ref, w2_ref, b2_ref,
                w3_ref, b3_ref, wo_ref, bo_ref, out_ref, *, LOUT, LP):
    """Fused Conv1d -> MaxPool1d -> fc1..fc3/out MLP -> log_softmax (one batch tile)."""
    x = x_ref[...]                                            # (TB, L, E_PAD) bf16

    # ---- Conv1d(E -> 64, k=3, valid) as ONE MXU contraction over K*E_PAD.
    # im2col on the lane axis: xc[b, t, k*E_PAD + e] = x[b, t + k, e]
    xc = jnp.concatenate([x[:, k:k + LOUT, :] for k in range(KSIZE)], axis=-1)
    conv = jnp.einsum('blf,fo->blo', xc, cw_ref[...],
                      preferred_element_type=jnp.float32)     # (TB, LOUT, 64) f32
    conv = conv + cb_ref[...]                                 # (1, 64) bias broadcast

    # ---- MaxPool1d(k=2) fused with PyTorch's channel-major flatten + fc1.
    # Build the flattened pooled activations on the lane axis (index p*64 + c),
    # then a single matmul; w1 was pre-permuted so w1[p*64 + c, j] equals
    # fc1.weight[j, c*LP + p], reproducing fc1(flatten(pool(conv))) exactly.
    even = jnp.concatenate([conv[:, 2 * p, :] for p in range(LP)], axis=-1)
    odd = jnp.concatenate([conv[:, 2 * p + 1, :] for p in range(LP)], axis=-1)
    flat = jnp.maximum(even, odd)                             # (TB, LP*64) f32

    h1 = jnp.maximum(
        jnp.dot(flat, w1_ref[...], preferred_element_type=jnp.float32)
        + b1_ref[...], 0.0)                                   # (TB, 4)
    h2 = jnp.maximum(
        jnp.dot(h1, w2_ref[...], preferred_element_type=jnp.float32)
        + b2_ref[...], 0.0)                                   # (TB, 3)
    h3 = jnp.maximum(
        jnp.dot(h2, w3_ref[...], preferred_element_type=jnp.float32)
        + b3_ref[...], 0.0)                                   # (TB, 3)
    logits = (jnp.dot(h3, wo_ref[...], preferred_element_type=jnp.float32)
              + bo_ref[...])                                  # (TB, 2)

    # ---- LogSoftmax(dim=1), numerically stable.
    m = jnp.max(logits, axis=-1, keepdims=True)
    z = logits - m
    lse = jnp.log(jnp.sum(jnp.exp(z), axis=-1, keepdims=True))
    out_ref[...] = (z - lse).astype(out_ref.dtype)


def cnn_forward(X, params, emb_matrix):
    """X: int32 token ids (B, L). Returns log-probs (B, 2) float32."""
    B, L = X.shape
    LOUT = L - KSIZE + 1
    LP = LOUT // 2

    # nn.Embedding lookup (pure gather) in plain-JAX glue; pad E 50->128 with
    # zeros (aligned unmasked MXU contraction) and cast to bf16 (halves the
    # HBM traffic of the dominant activation tensor).
    emb_p = jnp.zeros((emb_matrix.shape[0], E_PAD), jnp.bfloat16)
    emb_p = emb_p.at[:, :EMB_DIM].set(emb_matrix.astype(jnp.bfloat16))
    embedded = emb_p[X]                                       # (B, L, E_PAD) bf16

    # Batch tile: multiple of 8 sublanes, capped so the double-buffered input
    # tile stays well inside v7x's 64 MiB VMEM (v5e/v6e have 2x headroom).
    bytes_per_row = L * E_PAD * 2
    tb_cap = max(8, (8 * 1024 * 1024) // (2 * bytes_per_row))
    TB = int(min(128, tb_cap, 8 * pl.cdiv(B, 8)))
    TB = max(8, (TB // 8) * 8)
    B_pad = TB * pl.cdiv(B, TB)
    if B_pad != B:
        embedded = jnp.concatenate(
            [embedded, jnp.zeros((B_pad - B, L, E_PAD), embedded.dtype)], axis=0)

    # Pre-permute weights to the kernel's layout (pure reshapes/transposes).
    cw = jnp.transpose(params['conv_w'], (2, 1, 0))           # (K, E, 64)
    cw = jnp.pad(cw, ((0, 0), (0, E_PAD - EMB_DIM), (0, 0)))  # (K, E_PAD, 64)
    cw = cw.reshape(KSIZE * E_PAD, CONV_OUT).astype(jnp.bfloat16)
    cb = params['conv_b'].reshape(1, CONV_OUT).astype(jnp.float32)
    w1 = params['fc1_w'].reshape(4, CONV_OUT, LP).transpose(2, 1, 0)
    w1 = w1.reshape(LP * CONV_OUT, 4).astype(jnp.float32)     # (LP*64, 4)
    b1 = params['fc1_b'].reshape(1, 4)
    w2 = params['fc2_w'].T                                    # (4, 3)
    b2 = params['fc2_b'].reshape(1, 3)
    w3 = params['fc3_w'].T                                    # (3, 3)
    b3 = params['fc3_b'].reshape(1, 3)
    wo = params['out_w'].T                                    # (3, 2)
    bo = params['out_b'].reshape(1, 2)

    weights = (cw, cb, w1, b1, w2, b2, w3, b3, wo, bo)

    # Explicit VMEM limit sized from the tile (scoped default is conservative).
    est = (2 * TB * L * E_PAD * 2                             # double-buffered input tile
           + TB * LOUT * (KSIZE * E_PAD * 2 + CONV_OUT * 4)   # im2col + conv intermediates
           + 4 * TB * LP * CONV_OUT * 4                       # pooling temporaries
           + 2 * TB * 2 * 4                                   # double-buffered output tile
           + sum(int(w.size) * w.dtype.itemsize for w in weights)
           + (1 << 20))
    vmem_limit = int(min(max(2 * est, 32 * 1024 * 1024), 100 * 1024 * 1024))

    kernel = functools.partial(_cnn_kernel, LOUT=LOUT, LP=LP)
    weight_specs = [pl.BlockSpec(w.shape, lambda b: (0, 0)) for w in weights]

    out = pl.pallas_call(
        kernel,
        out_shape=jax.ShapeDtypeStruct((B_pad, 2), jnp.float32),
        grid=(B_pad // TB,),
        in_specs=[pl.BlockSpec((TB, L, E_PAD), lambda b: (b, 0, 0))]
                 + weight_specs,
        out_specs=pl.BlockSpec((TB, 2), lambda b: (b, 0)),
        compiler_params=pltpu.CompilerParams(
            dimension_semantics=("parallel",),
            vmem_limit_bytes=vmem_limit),
    )(embedded, *weights)
    return out[:B]


def init_params(key, vocab_size, seq_len):
    """Deterministic synthetic parameters (PyTorch-style uniform init)."""
    LOUT = seq_len - KSIZE + 1
    LP = LOUT // 2
    flat = CONV_OUT * LP
    ks = jax.random.split(key, 11)

    def u(k, shape, fan_in):
        bound = 1.0 / float(fan_in) ** 0.5
        return jax.random.uniform(k, shape, jnp.float32, -bound, bound)

    emb_matrix = jax.random.normal(ks[0], (vocab_size, EMB_DIM), jnp.float32)
    params = dict(
        conv_w=u(ks[1], (CONV_OUT, EMB_DIM, KSIZE), EMB_DIM * KSIZE),
        conv_b=u(ks[2], (CONV_OUT,), EMB_DIM * KSIZE),
        fc1_w=u(ks[3], (4, flat), flat),
        fc1_b=u(ks[4], (4,), flat),
        fc2_w=u(ks[5], (3, 4), 4),
        fc2_b=u(ks[6], (3,), 4),
        fc3_w=u(ks[7], (3, 3), 3),
        fc3_b=u(ks[8], (3,), 3),
        out_w=u(ks[9], (2, 3), 3),
        out_b=u(ks[10], (2,), 3),
    )
    return emb_matrix, params


if __name__ == "__main__":
    vocab_size, seq_len, batch = 32, 8, 2
    key = jax.random.PRNGKey(0)
    k_params, k_x = jax.random.split(key)

    emb_matrix, params = init_params(k_params, vocab_size, seq_len)
    X = jax.random.randint(k_x, (batch, seq_len), 0, vocab_size,
                           dtype=jnp.int32)

    log_probs = cnn_forward(X, params, emb_matrix)
    jax.block_until_ready(log_probs)

    assert log_probs.shape == (batch, 2)
    assert bool(jnp.all(jnp.isfinite(log_probs)))
    # rows of exp(log_probs) should sum to 1 (log-softmax check)
    assert bool(jnp.allclose(jnp.exp(log_probs).sum(axis=1), 1.0, atol=1e-5))
    print("KERNEL_OK")
</pallas_src>

<mosaic_0001>
module attributes {stable_mosaic.version = 11 : i64} {
  func.func @_cnn_kernel(%arg0: i32, %arg1: memref<8x8x128xbf16, #tpu.memory_space<vmem>>, %arg2: memref<384x64xbf16, #tpu.memory_space<vmem>>, %arg3: memref<1x64xf32, #tpu.memory_space<vmem>>, %arg4: memref<192x4xf32, #tpu.memory_space<vmem>>, %arg5: memref<1x4xf32, #tpu.memory_space<vmem>>, %arg6: memref<4x3xf32, #tpu.memory_space<vmem>>, %arg7: memref<1x3xf32, #tpu.memory_space<vmem>>, %arg8: memref<3x3xf32, #tpu.memory_space<vmem>>, %arg9: memref<1x3xf32, #tpu.memory_space<vmem>>, %arg10: memref<3x2xf32, #tpu.memory_space<vmem>>, %arg11: memref<1x2xf32, #tpu.memory_space<vmem>>, %arg12: memref<8x2xf32, #tpu.memory_space<vmem>>) attributes {dimension_semantics = [#tpu.dimension_semantics<parallel>], iteration_bounds = array<i64: 1>, scalar_prefetch = 0 : i64, scratch_operands = 0 : i64, tpu.core_type = #tpu.core_type<tc>, window_params = [{transform_indices = @transform_0, window_bounds = array<i64: 8, 8, 128>}, {pipeline_mode = #tpu.pipeline_mode<synchronous>, transform_indices = @transform_1, window_bounds = array<i64: 384, 64>}, {pipeline_mode = #tpu.pipeline_mode<synchronous>, transform_indices = @transform_2, window_bounds = array<i64: 1, 64>}, {pipeline_mode = #tpu.pipeline_mode<synchronous>, transform_indices = @transform_3, window_bounds = array<i64: 192, 4>}, {pipeline_mode = #tpu.pipeline_mode<synchronous>, transform_indices = @transform_4, window_bounds = array<i64: 1, 4>}, {pipeline_mode = #tpu.pipeline_mode<synchronous>, transform_indices = @transform_5, window_bounds = array<i64: 4, 3>}, {pipeline_mode = #tpu.pipeline_mode<synchronous>, transform_indices = @transform_6, window_bounds = array<i64: 1, 3>}, {pipeline_mode = #tpu.pipeline_mode<synchronous>, transform_indices = @transform_7, window_bounds = array<i64: 3, 3>}, {pipeline_mode = #tpu.pipeline_mode<synchronous>, transform_indices = @transform_8, window_bounds = array<i64: 1, 3>}, {pipeline_mode = #tpu.pipeline_mode<synchronous>, transform_indices = @transform_9, window_bounds = array<i64: 3, 2>}, {pipeline_mode = #tpu.pipeline_mode<synchronous>, transform_indices = @transform_10, window_bounds = array<i64: 1, 2>}, {transform_indices = @transform_11, window_bounds = array<i64: 8, 2>}]} {
    %c0 = arith.constant 0 : index
    %c0_0 = arith.constant 0 : index
    %c0_1 = arith.constant 0 : index
    %0 = vector.load %arg1[%c0, %c0_0, %c0_1] : memref<8x8x128xbf16, #tpu.memory_space<vmem>>, vector<8x8x128xbf16>
    %1 = vector.extract_strided_slice %0 {offsets = [0, 0, 0], sizes = [8, 6, 128], strides = [1, 1, 1]} : vector<8x8x128xbf16> to vector<8x6x128xbf16>
    %2 = vector.extract_strided_slice %0 {offsets = [0, 1, 0], sizes = [8, 6, 128], strides = [1, 1, 1]} : vector<8x8x128xbf16> to vector<8x6x128xbf16>
    %3 = vector.extract_strided_slice %0 {offsets = [0, 2, 0], sizes = [8, 6, 128], strides = [1, 1, 1]} : vector<8x8x128xbf16> to vector<8x6x128xbf16>
    %4 = tpu.concatenate %1, %2, %3 in 2 : vector<8x6x128xbf16>, vector<8x6x128xbf16>, vector<8x6x128xbf16> -> vector<8x6x384xbf16>
    %c0_2 = arith.constant 0 : index
    %c0_3 = arith.constant 0 : index
    %5 = vector.load %arg2[%c0_2, %c0_3] : memref<384x64xbf16, #tpu.memory_space<vmem>>, vector<384x64xbf16>
    "tpu.trace_start"() <{level = 10 : i32, message = "blf,fo->blo"}> : () -> ()
    %cst = arith.constant dense<0.000000e+00> : vector<8x6x64xf32>
    %6 = tpu.matmul %4, %5, %cst {dimension_numbers = #tpu.dot_dimension_numbers<[2], [0], [0, 1], [1], [0, 0, 0, 1, 1, 1], [], []>} : vector<8x6x384xbf16>, vector<384x64xbf16>, vector<8x6x64xf32> -> vector<8x6x64xf32>
    "tpu.trace_stop"() : () -> ()
    %c0_4 = arith.constant 0 : index
    %c0_5 = arith.constant 0 : index
    %7 = vector.load %arg3[%c0_4, %c0_5] : memref<1x64xf32, #tpu.memory_space<vmem>>, vector<1x64xf32>
    %8 = vector.shape_cast %7 : vector<1x64xf32> to vector<1x1x64xf32>
    %9 = vector.broadcast %8 : vector<1x1x64xf32> to vector<8x6x64xf32>
    %10 = arith.addf %6, %9 : vector<8x6x64xf32>
    %11 = vector.extract_strided_slice %10 {offsets = [0, 0, 0], sizes = [8, 1, 64], strides = [1, 1, 1]} : vector<8x6x64xf32> to vector<8x1x64xf32>
    %12 = vector.shape_cast %11 : vector<8x1x64xf32> to vector<8x64xf32>
    %13 = vector.extract_strided_slice %10 {offsets = [0, 2, 0], sizes = [8, 1, 64], strides = [1, 1, 1]} : vector<8x6x64xf32> to vector<8x1x64xf32>
    %14 = vector.shape_cast %13 : vector<8x1x64xf32> to vector<8x64xf32>
    %15 = vector.extract_strided_slice %10 {offsets = [0, 4, 0], sizes = [8, 1, 64], strides = [1, 1, 1]} : vector<8x6x64xf32> to vector<8x1x64xf32>
    %16 = vector.shape_cast %15 : vector<8x1x64xf32> to vector<8x64xf32>
    %17 = tpu.concatenate %12, %14, %16 in 1 : vector<8x64xf32>, vector<8x64xf32>, vector<8x64xf32> -> vector<8x192xf32>
    %18 = vector.extract_strided_slice %10 {offsets = [0, 1, 0], sizes = [8, 1, 64], strides = [1, 1, 1]} : vector<8x6x64xf32> to vector<8x1x64xf32>
    %19 = vector.shape_cast %18 : vector<8x1x64xf32> to vector<8x64xf32>
    %20 = vector.extract_strided_slice %10 {offsets = [0, 3, 0], sizes = [8, 1, 64], strides = [1, 1, 1]} : vector<8x6x64xf32> to vector<8x1x64xf32>
    %21 = vector.shape_cast %20 : vector<8x1x64xf32> to vector<8x64xf32>
    %22 = vector.extract_strided_slice %10 {offsets = [0, 5, 0], sizes = [8, 1, 64], strides = [1, 1, 1]} : vector<8x6x64xf32> to vector<8x1x64xf32>
    %23 = vector.shape_cast %22 : vector<8x1x64xf32> to vector<8x64xf32>
    %24 = tpu.concatenate %19, %21, %23 in 1 : vector<8x64xf32>, vector<8x64xf32>, vector<8x64xf32> -> vector<8x192xf32>
    %25 = arith.maximumf %17, %24 : vector<8x192xf32>
    %c0_6 = arith.constant 0 : index
    %c0_7 = arith.constant 0 : index
    %26 = vector.load %arg4[%c0_6, %c0_7] : memref<192x4xf32, #tpu.memory_space<vmem>>, vector<192x4xf32>
    %cst_8 = arith.constant dense<0.000000e+00> : vector<8x4xf32>
    %27 = tpu.matmul %25, %26, %cst_8 {dimension_numbers = #tpu.dot_dimension_numbers<[1], [0], [0], [1], [0, 0, 1, 1], [], []>} : vector<8x192xf32>, vector<192x4xf32>, vector<8x4xf32> -> vector<8x4xf32>
    %c0_9 = arith.constant 0 : index
    %c0_10 = arith.constant 0 : index
    %28 = vector.load %arg5[%c0_9, %c0_10] : memref<1x4xf32, #tpu.memory_space<vmem>>, vector<1x4xf32>
    %29 = vector.broadcast %28 : vector<1x4xf32> to vector<8x4xf32>
    %30 = arith.addf %27, %29 : vector<8x4xf32>
    %cst_11 = arith.constant 0.000000e+00 : f32
    %31 = vector.broadcast %cst_11 : f32 to vector<8x4xf32>
    %32 = arith.maximumf %30, %31 : vector<8x4xf32>
    %c0_12 = arith.constant 0 : index
    %c0_13 = arith.constant 0 : index
    %33 = vector.load %arg6[%c0_12, %c0_13] : memref<4x3xf32, #tpu.memory_space<vmem>>, vector<4x3xf32>
    %cst_14 = arith.constant dense<0.000000e+00> : vector<8x3xf32>
    %34 = tpu.matmul %32, %33, %cst_14 {dimension_numbers = #tpu.dot_dimension_numbers<[1], [0], [0], [1], [0, 0, 1, 1], [], []>} : vector<8x4xf32>, vector<4x3xf32>, vector<8x3xf32> -> vector<8x3xf32>
    %c0_15 = arith.constant 0 : index
    %c0_16 = arith.constant 0 : index
    %35 = vector.load %arg7[%c0_15, %c0_16] : memref<1x3xf32, #tpu.memory_space<vmem>>, vector<1x3xf32>
    %36 = vector.broadcast %35 : vector<1x3xf32> to vector<8x3xf32>
    %37 = arith.addf %34, %36 : vector<8x3xf32>
    %cst_17 = arith.constant 0.000000e+00 : f32
    %38 = vector.broadcast %cst_17 : f32 to vector<8x3xf32>
    %39 = arith.maximumf %37, %38 : vector<8x3xf32>
    %c0_18 = arith.constant 0 : index
    %c0_19 = arith.constant 0 : index
    %40 = vector.load %arg8[%c0_18, %c0_19] : memref<3x3xf32, #tpu.memory_space<vmem>>, vector<3x3xf32>
    %cst_20 = arith.constant dense<0.000000e+00> : vector<8x3xf32>
    %41 = tpu.matmul %39, %40, %cst_20 {dimension_numbers = #tpu.dot_dimension_numbers<[1], [0], [0], [1], [0, 0, 1, 1], [], []>} : vector<8x3xf32>, vector<3x3xf32>, vector<8x3xf32> -> vector<8x3xf32>
    %c0_21 = arith.constant 0 : index
    %c0_22 = arith.constant 0 : index
    %42 = vector.load %arg9[%c0_21, %c0_22] : memref<1x3xf32, #tpu.memory_space<vmem>>, vector<1x3xf32>
    %43 = vector.broadcast %42 : vector<1x3xf32> to vector<8x3xf32>
    %44 = arith.addf %41, %43 : vector<8x3xf32>
    %cst_23 = arith.constant 0.000000e+00 : f32
    %45 = vector.broadcast %cst_23 : f32 to vector<8x3xf32>
    %46 = arith.maximumf %44, %45 : vector<8x3xf32>
    %c0_24 = arith.constant 0 : index
    %c0_25 = arith.constant 0 : index
    %47 = vector.load %arg10[%c0_24, %c0_25] : memref<3x2xf32, #tpu.memory_space<vmem>>, vector<3x2xf32>
    %cst_26 = arith.constant dense<0.000000e+00> : vector<8x2xf32>
    %48 = tpu.matmul %46, %47, %cst_26 {dimension_numbers = #tpu.dot_dimension_numbers<[1], [0], [0], [1], [0, 0, 1, 1], [], []>} : vector<8x3xf32>, vector<3x2xf32>, vector<8x2xf32> -> vector<8x2xf32>
    %c0_27 = arith.constant 0 : index
    %c0_28 = arith.constant 0 : index
    %49 = vector.load %arg11[%c0_27, %c0_28] : memref<1x2xf32, #tpu.memory_space<vmem>>, vector<1x2xf32>
    %50 = vector.broadcast %49 : vector<1x2xf32> to vector<8x2xf32>
    %51 = arith.addf %48, %50 : vector<8x2xf32>
    %cst_29 = arith.constant dense<0xFF800000> : vector<8xf32>
    %52 = vector.multi_reduction <maximumf>, %51, %cst_29 [1] : vector<8x2xf32> to vector<8xf32>
    %53 = vector.shape_cast %52 : vector<8xf32> to vector<8x1xf32>
    %54 = vector.broadcast %53 : vector<8x1xf32> to vector<8x2xf32>
    %55 = arith.subf %51, %54 : vector<8x2xf32>
    %56 = math.exp %55 : vector<8x2xf32>
    %cst_30 = arith.constant dense<0.000000e+00> : vector<8xf32>
    %57 = vector.multi_reduction <add>, %56, %cst_30 [1] : vector<8x2xf32> to vector<8xf32>
    %58 = vector.shape_cast %57 : vector<8xf32> to vector<8x1xf32>
    %59 = math.log %58 : vector<8x1xf32>
    %60 = vector.broadcast %59 : vector<8x1xf32> to vector<8x2xf32>
    %61 = arith.subf %55, %60 : vector<8x2xf32>
    %c0_31 = arith.constant 0 : index
    %c0_32 = arith.constant 0 : index
    %62 = vector.load %arg12[%c0_31, %c0_32] : memref<8x2xf32, #tpu.memory_space<vmem>>, vector<8x2xf32>
    tpu.vector_store %arg12[%c0_31, %c0_32], %61 {strides = array<i32>} : memref<8x2xf32, #tpu.memory_space<vmem>>, vector<8x2xf32>,
    return
  }
  func.func @transform_0(%arg0: i32) -> (i32, i32, i32) {
    %c0_i32 = arith.constant 0 : i32
    %c0_i32_0 = arith.constant 0 : i32
    %c0_i32_1 = arith.constant 0 : i32
    return %arg0, %c0_i32, %c0_i32_0 : i32, i32, i32
  }
  func.func @transform_1(%arg0: i32) -> (i32, i32) {
    %c0_i32 = arith.constant 0 : i32
    %c0_i32_0 = arith.constant 0 : i32
    %c0_i32_1 = arith.constant 0 : i32
    return %c0_i32, %c0_i32_0 : i32, i32
  }
  func.func @transform_2(%arg0: i32) -> (i32, i32) {
    %c0_i32 = arith.constant 0 : i32
    %c0_i32_0 = arith.constant 0 : i32
    %c0_i32_1 = arith.constant 0 : i32
    return %c0_i32, %c0_i32_0 : i32, i32
  }
  func.func @transform_3(%arg0: i32) -> (i32, i32) {
    %c0_i32 = arith.constant 0 : i32
    %c0_i32_0 = arith.constant 0 : i32
    %c0_i32_1 = arith.constant 0 : i32
    return %c0_i32, %c0_i32_0 : i32, i32
  }
  func.func @transform_4(%arg0: i32) -> (i32, i32) {
    %c0_i32 = arith.constant 0 : i32
    %c0_i32_0 = arith.constant 0 : i32
    %c0_i32_1 = arith.constant 0 : i32
    return %c0_i32, %c0_i32_0 : i32, i32
  }
  func.func @transform_5(%arg0: i32) -> (i32, i32) {
    %c0_i32 = arith.constant 0 : i32
    %c0_i32_0 = arith.constant 0 : i32
    %c0_i32_1 = arith.constant 0 : i32
    return %c0_i32, %c0_i32_0 : i32, i32
  }
  func.func @transform_6(%arg0: i32) -> (i32, i32) {
    %c0_i32 = arith.constant 0 : i32
    %c0_i32_0 = arith.constant 0 : i32
    %c0_i32_1 = arith.constant 0 : i32
    return %c0_i32, %c0_i32_0 : i32, i32
  }
  func.func @transform_7(%arg0: i32) -> (i32, i32) {
    %c0_i32 = arith.constant 0 : i32
    %c0_i32_0 = arith.constant 0 : i32
    %c0_i32_1 = arith.constant 0 : i32
    return %c0_i32, %c0_i32_0 : i32, i32
  }
  func.func @transform_8(%arg0: i32) -> (i32, i32) {
    %c0_i32 = arith.constant 0 : i32
    %c0_i32_0 = arith.constant 0 : i32
    %c0_i32_1 = arith.constant 0 : i32
    return %c0_i32, %c0_i32_0 : i32, i32
  }
  func.func @transform_9(%arg0: i32) -> (i32, i32) {
    %c0_i32 = arith.constant 0 : i32
    %c0_i32_0 = arith.constant 0 : i32
    %c0_i32_1 = arith.constant 0 : i32
    return %c0_i32, %c0_i32_0 : i32, i32
  }
  func.func @transform_10(%arg0: i32) -> (i32, i32) {
    %c0_i32 = arith.constant 0 : i32
    %c0_i32_0 = arith.constant 0 : i32
    %c0_i32_1 = arith.constant 0 : i32
    return %c0_i32, %c0_i32_0 : i32, i32
  }
  func.func @transform_11(%arg0: i32) -> (i32, i32) {
    %c0_i32 = arith.constant 0 : i32
    %c0_i32_0 = arith.constant 0 : i32
    return %arg0, %c0_i32 : i32, i32
  }
}

</mosaic_0001>

<bundles_post_ra>
// kernel: tpu_custom_call.1
= control target key start
LH: loop header
LB: loop body
LE: loop exit
PB: predicated region body
PF: predicated region fallthrough
CT: control target
= control target key end

     0   :  { %v1937_v1 = vmov 0.0   ;;  %vm1938_vm0 = vmmov 0   ;;  %v1939_v17 = vmov 1966171168   ;;  %v193_v19 = vlaneseq  ;;  %s2448_s1 = inlined_call_operand.vmem [shape: bf16[384,64], index: 1, kind: input, shape index: {}]   ;;  %s2449_s0 = inlined_call_operand.vmem [shape: bf16[8,8,128], index: 0, kind: input, shape index: {}]   ;;  %s2450_s3 = inlined_call_operand.vmem [shape: f32[192,4], index: 3, kind: input, shape index: {}]   ;;  %s2451_s2 = inlined_call_operand.vmem [shape: f32[1,64], index: 2, kind: input, shape index: {}]   ;;  %s2452_s5 = inlined_call_operand.vmem [shape: f32[4,3], index: 5, kind: input, shape index: {}]   ;;  %s2453_s4 = inlined_call_operand.vmem [shape: f32[1,4], index: 4, kind: input, shape index: {}]   ;;  %s2454_s7 = inlined_call_operand.vmem [shape: f32[3,3], index: 7, kind: input, shape index: {}]   ;;  %s2455_s6 = inlined_call_operand.vmem [shape: f32[1,3], index: 6, kind: input, shape index: {}]   ;;  %s2456_s9 = inlined_call_operand.vmem [shape: f32[3,2], index: 9, kind: input, shape index: {}]   ;;  %s2457_s8 = inlined_call_operand.vmem [shape: f32[1,3], index: 8, kind: input, shape index: {}]   ;;  %s2458_s10 = inlined_call_operand.vmem [shape: f32[1,2], index: 10, kind: input, shape index: {}]   ;;  %s2459_s11 = inlined_call_operand.vmem [shape: f32[8,2], index: 11, kind: output, shape index: {}]  }
   0x1   :  { %v1901_v0 = vld [vmem:[%s2448_s1 + $0x40] sm:$0xff]   ;;  %1811 = vmatprep.subr.bf16.mxu1 %v1937_v1  ;;  %1827 = vmatprep.mubr.msk.bf16.mxu1 %vm1938_vm0, %v1937_v1  ;;  %v1904_v4 = vld [vmem:[%s2448_s1 + $0x48] sm:$0xff]   ;;  %v1907_v7 = vld [vmem:[%s2448_s1 + $0x50] sm:$0xff]   ;;  %v191_v18 = vunpack.c.l.s4 %v1939_v17  ;;  %vm1099_vm1 = vcmask 1041409   ;;  %vm1101_vm2 = vcmask 1042434   ;;  %vm1103_vm3 = vcmask 1043459  }
   0x2   :  { %v1902_v2 = vld [vmem:[%s2448_s1] sm:$0xff]   ;;  %1760 = vmatprep.subr.bf16.mxu0 %v1901_v0  ;;  %v1905_v5 = vld [vmem:[%s2448_s1 + $0x8] sm:$0xff]   ;;  %v1908_v8 = vld [vmem:[%s2448_s1 + $0x10] sm:$0xff]   ;;  %v2071_v25 = vshrl.u32 %v193_v19, 7  ;;  %vm1105_vm4 = vcmask 1044484   ;;  %vm1107_vm5 = vcmask 1045509  }
   0x3   :  { %v1903_v3 = vld [vmem:[%s2448_s1 + $0x80] sm:$0xff]   ;;  %1761 = vmatpush3.bf16.msra.mxu0 %v1902_v2  ;;  %v1906_v6 = vld [vmem:[%s2448_s1 + $0x88] sm:$0xff]   ;;  %v1909_v9 = vld [vmem:[%s2448_s1 + $0x90] sm:$0xff]   ;;  %v192_v24 = vunpack.c.0.s8 %v191_v18  ;;  %vm1109_vm6 = vcmask 1046534   ;;  %vm1111_vm7 = vcmask 1047559   ;;  %vm1324_vm8 = vcmask 1046528  }
   0x4   :  { %1812 = vmatpush3.bf16.msra.mxu1 %v1903_v3  ;;  %1762 = vmatprep.subr.bf16.mxu0 %v1904_v4  ;;  %v1910_v10 = vld [vmem:[%s2448_s1 + $0x58] sm:$0xff]   ;;  %v1913_v13 = vld [vmem:[%s2448_s1 + $0x60] sm:$0xff]   ;;  %v1916_v16 = vld [vmem:[%s2448_s1 + $0x68] sm:$0xff]   ;;  %vm1452_vm9 = vcmask 1043456   ;;  %vm1196_vm10 = vcmask 523264   ;;  %vm1448_vm11 = vcmask 31744  }
   0x5   :  { %1813 = vmatprep.subr.bf16.mxu1 %v1937_v1  ;;  %v1911_v11 = vld [vmem:[%s2448_s1 + $0x18] sm:$0xff]   ;;  %v1914_v14 = vld [vmem:[%s2448_s1 + $0x20] sm:$0xff]   ;;  %v1917_v20 = vld [vmem:[%s2448_s1 + $0x28] sm:$0xff]   ;;  %v2093_v35 = vsub.s32 %v192_v24, %v2071_v25  ;;  %vm1539_vm12 = vcmask 1042432   ;;  %vm1535_vm13 = vcmask 23552   ;;  %vm1698_vm14 = vcmask 15360  }
   0x6   :  { %v1912_v12 = vld [vmem:[%s2448_s1 + $0x98] sm:$0xff]   ;;  %v1915_v15 = vld [vmem:[%s2448_s1 + $0xa0] sm:$0xff]   ;;  %v1918_v21 = vld [vmem:[%s2448_s1 + $0xa8] sm:$0xff]  }
   0x7   :  { %1763 = vmatpush3.bf16.msra.mxu0 %v1905_v5  ;;  %v1919_v22 = vld [vmem:[%s2448_s1 + $0x70] sm:$0xff]   ;;  %v39_v27 = vld [vmem:[%s2449_s0] sm:$0xf]  ;;  %v40_v28 = vld [vmem:[%s2449_s0 + $0x4] sm:$0xf] }
   0x8   :  { %1814 = vmatpush3.bf16.msra.mxu1 %v1906_v6  ;;  %1764 = vmatprep.subr.bf16.mxu0 %v1907_v7  ;;  %v1920_v23 = vld [vmem:[%s2448_s1 + $0x30] sm:$0xff]   ;;  %v41_v29 = vld [vmem:[%s2449_s0 + $0x8] sm:$0xf]  ;;  %v1922_v30 = vld [vmem:[%s2448_s1 + $0x78] sm:$0xff]   ;;  %v1716_v31 = vcombine.low %v39_v27, %v39_v27  ;;  %v1717_v32 = vcombine.low %v40_v28, %v40_v28 }
   0x9   :  { %1815 = vmatprep.subr.bf16.mxu1 %v1937_v1  ;;  %v1921_v26 = vld [vmem:[%s2448_s1 + $0xb0] sm:$0xff]   ;;  %v1718_v33 = vcombine.low %v41_v29, %v41_v29  ;;  %v1923_v34 = vld [vmem:[%s2448_s1 + $0x38] sm:$0xff]   ;;  %v2098_v36 = vld [vmem:[%s2449_s0 + $0xc] sm:$0xf] }
   0xa   :  { %v72_v37 = vshrl.u32 %v1716_v31, 16  ;;  %v74_v38 = vshll.u32 %v1716_v31, 16  ;;  %v79_v39 = vshrl.u32 %v1717_v32, 16  ;;  %v81_v40 = vshll.u32 %v1717_v32, 16  ;;  %v2103_v41 = vld [vmem:[%s2449_s0 + $0x10] sm:$0xf] }
   0xb   :  { %1765 = vmatpush3.bf16.msra.mxu0 %v1908_v8  ;;  %v86_v42 = vshrl.u32 %v1718_v33, 16  ;;  %v88_v43 = vshll.u32 %v1718_v33, 16  ;;  %v127_v44 = vrot.slane %v1716_v31, 1  ;;  %v128_v45 = vrot.slane %v1717_v32, 1  ;;  %v2108_v46 = vld [vmem:[%s2449_s0 + $0x14] sm:$0xf] }
   0xc   :  { %1816 = vmatpush3.bf16.msra.mxu1 %v1909_v9  ;;  %1766 = vmatprep.subr.bf16.mxu0 %v1910_v10  ;;  %v76_v47 = vrot.slane %v74_v38, 1  ;;  %v83_v48 = vrot.slane %v81_v40, 1  ;;  %v129_v49 = vrot.slane %v1718_v33, 1  ;;  %v1927_v50 = vld [vmem:[%s2448_s1 + $0xb8] sm:$0xff]   ;;  %v1719_v51 = vcombine.low %v2098_v36, %v2098_v36 }
   0xd   :  { %1817 = vmatprep.subr.bf16.mxu1 %v1937_v1  ;;  %v90_v52 = vrot.slane %v88_v43, 1  ;;  %v203_v53 = vrot.slane %v127_v44, %v2093_v35  ;;  %v235_v54 = vrot.slane %v128_v45, %v2093_v35  ;;  %v1720_v55 = vcombine.low %v2103_v41, %v2103_v41 }
   0xe   :  { %v77_v56 = vor.u32 %v76_v47, %v72_v37  ;;  %v84_v57 = vor.u32 %v83_v48, %v79_v39  ;;  %v267_v58 = vrot.slane %v129_v49, %v2093_v35  ;;  %v2123_v59 = vcombine.low %v2108_v46, %v2108_v46 }
   0xf   :  { %1767 = vmatpush3.bf16.msra.mxu0 %v1911_v11  ;;  %v91_v60 = vor.u32 %v90_v52, %v86_v42  ;;  %v93_v61 = vshrl.u32 %v1719_v51, 16  ;;  %v95_v62 = vshll.u32 %v1719_v51, 16  ;;  %v100_v63 = vshrl.u32 %v1720_v55, 16 }
  0x10   :  { %1818 = vmatpush3.bf16.msra.mxu1 %v1912_v12  ;;  %1768 = vmatprep.subr.bf16.mxu0 %v1913_v13  ;;  %v189_v0 = vcombine.low %v39_v27, %v77_v56  ;;  %v221_v2 = vcombine.low %v40_v28, %v84_v57  ;;  %v102_v3 = vshll.u32 %v1720_v55, 16  ;;  %v107_v4 = vshrl.u32 %v2123_v59, 16 }
  0x11   :  { %1819 = vmatprep.subr.bf16.mxu1 %v1937_v1  ;;  %v253_v5 = vcombine.low %v41_v29, %v91_v60  ;;  %v97_v6 = vrot.slane %v95_v62, 1  ;;  %v109_v7 = vshll.u32 %v2123_v59, 16  ;;  %v130_v8 = vrot.slane %v1719_v51, 1 }
  0x12   :  { %v196_v9 = vrot.slane %v189_v0, %v2093_v35  ;;  %v228_v10 = vrot.slane %v221_v2, %v2093_v35  ;;  %v104_v11 = vrot.slane %v102_v3, 1  ;;  %v131_v12 = vrot.slane %v1720_v55, 1 }
  0x13   :  { %1769 = vmatpush3.bf16.msra.mxu0 %v1914_v14  ;;  %v260_v13 = vrot.slane %v253_v5, %v2093_v35  ;;  %v98_v14 = vor.u32 %v97_v6, %v93_v61  ;;  %v299_v33 = vrot.slane %v130_v8, %v2093_v35  ;;  %v45_v8 = vld [vmem:[%s2449_s0 + $0x18] sm:$0xf] }
  0x14   :  { %1820 = vmatpush3.bf16.msra.mxu1 %v1915_v15  ;;  %1770 = vmatprep.subr.bf16.mxu0 %v1916_v16  ;;  %v111_v15 = vrot.slane %v109_v7, 1  ;;  %v132_v16 = vrot.slane %v2123_v59, 1  ;;  %v204_v17 = vcombine.low %v196_v9, %v203_v53  ;;  %v205_v18 = vcombine.high %v196_v9, %v203_v53 }
  0x15   :  { %1821 = vmatprep.subr.bf16.mxu1 %v1937_v1  ;;  %v236_v19 = vcombine.low %v228_v10, %v235_v54  ;;  %v285_v32 = vcombine.low %v2098_v36, %v98_v14  ;;  %v331_v44 = vrot.slane %v131_v12, %v2093_v35 }
  0x16   :  { %v112_v24 = vor.u32 %v111_v15, %v107_v4  ;;  %v219_v27 = vrot.slane %v205_v18, %v2093_v35  ;;  %v363_v59 = vrot.slane %v132_v16, %v2093_v35 }
  0x17   :  { %1771 = vmatpush3.bf16.msra.mxu0 %v1917_v20  ;;  %v237_v20 = vcombine.high %v228_v10, %v235_v54  ;;  %v244_v28 = vrot.slane %v236_v19, %v2093_v35  ;;  %v292_v43 = vrot.slane %v285_v32, %v2093_v35 }
  0x18   :  { %1822 = vmatpush3.bf16.msra.mxu1 %v1918_v21  ;;  %1772 = vmatprep.subr.bf16.mxu0 %v1919_v22  ;;  %v268_v21 = vcombine.low %v260_v13, %v267_v58  ;;  %v269_v22 = vcombine.high %v260_v13, %v267_v58  ;;  %v349_v52 = vcombine.low %v2108_v46, %v112_v24  ;;  %v46_v13 = vld [vmem:[%s2449_s0 + $0x1c] sm:$0xf] }
  0x19   :  { %1823 = vmatprep.subr.bf16.mxu1 %v1937_v1  ;;  %v251_v29 = vrot.slane %v237_v20, %v2093_v35  ;;  %v252_v37 = vcombine.high %v244_v28, %v244_v28  ;;  %v301_v51 = vcombine.high %v292_v43, %v299_v33 }
  0x1a   :  { %v283_v31 = vrot.slane %v269_v22, %v2093_v35  ;;  %v356_v58 = vrot.slane %v349_v52, %v2093_v35 }
  0x1b   :  { %1773 = vmatpush3.bf16.msra.mxu0 %v1920_v23  ;;  %v105_v23 = vor.u32 %v104_v11, %v100_v63  ;;  %v463_v47 = vcombine.low %v251_v29, %v252_v37  ;;  %v315_v57 = vrot.slane %v301_v51, %v2093_v35 }
  0x1c   :  { %1824 = vmatpush3.bf16.msra.mxu1 %v1921_v26  ;;  %1774 = vmatprep.subr.bf16.mxu0 %v1922_v30  ;;  %v212_v26 = vrot.slane %v204_v17, %v2093_v35  ;;  %v276_v30 = vrot.slane %v268_v21, %v2093_v35  ;;  %v364_v3 = vcombine.low %v356_v58, %v363_v59 }
  0x1d   :  { %1825 = vmatprep.subr.bf16.mxu1 %v1937_v1  ;;  %v317_v39 = vcombine.low %v2103_v41, %v105_v23  ;;  %v485_v53 = vrot.slane %v463_v47, %v2093_v35  ;;  %v1722_v21 = vcombine.low %v45_v8, %v45_v8  ;;  %v1723_v23 = vcombine.low %v46_v13, %v46_v13 }
  0x1e   :  { %v461_v38 = vcombine.low %v212_v26, %v219_v27  ;;  %v284_v40 = vcombine.high %v276_v30, %v276_v30  ;;  %v464_v42 = vcombine.low %v276_v30, %v283_v31  ;;  %v372_v10 = vrot.slane %v364_v3, %v2093_v35 }
  0x1f   :  { %1775 = vmatpush3.bf16.msra.mxu0 %v1923_v34  ;;  %v220_v34 = vcombine.high %v212_v26, %v212_v26  ;;  %v324_v49 = vrot.slane %v317_v39, %v2093_v35  ;;  %v365_v24 = vcombine.high %v356_v58, %v363_v59  ;;  %v114_v29 = vshrl.u32 %v1722_v21, 16 }
  0x20   :  { %1826 = vmatpush3.bf16.msra.mxu1 %v1927_v50  ;;  %v471_v48 = vrot.slane %v461_v38, %v2093_v35  ;;  %v492_v36 = vrot.slane %v464_v42, %v2093_v35  ;;  %v300_v50 = vcombine.low %v292_v43, %v299_v33  ;;  %v116_v30 = vshll.u32 %v1722_v21, 16 }
  0x21   :  { %1839 = vmatprep.subr.mxu1 %v1937_v1  ;;  %v462_v45 = vcombine.low %v220_v34, %v244_v28  ;;  %v332_v54 = vcombine.low %v324_v49, %v331_v44  ;;  %v333_v55 = vcombine.high %v324_v49, %v331_v44  ;;  %v121_v31 = vshrl.u32 %v1723_v23, 16 }
  0x22   :  { %v308_v56 = vrot.slane %v300_v50, %v2093_v35  ;;  %v496_v61 = vcombine.high %v485_v53, %v492_v36  ;;  %v495_v63 = vcombine.low %v485_v53, %v492_v36  ;;  %v123_v32 = vshll.u32 %v1723_v23, 16 }
  0x23   :  { %v478_v41 = vrot.slane %v462_v45, %v2093_v35  ;;  %v340_v46 = vrot.slane %v332_v54, %v2093_v35  ;;  %v347_v2 = vrot.slane %v333_v55, %v2093_v35  ;;  %v118_v39 = vrot.slane %v116_v30, 1  ;;  %v1339_v30 = vld [vmem:[%s2450_s3 + $0x20] sm:$0xff] }
  0x24   :  { %v316_v0 = vcombine.high %v308_v56, %v308_v56  ;;  %v524_v5 = vrot.slane %v496_v61, %v2093_v35  ;;  %v517_v7 = vrot.slane %v495_v63, %v2093_v35  ;;  %v528_v11 = vcombine.low %v284_v40, %v308_v56 }
  0x25   :  { %v494_v60 = vcombine.high %v471_v48, %v478_v41  ;;  %v493_v62 = vcombine.low %v471_v48, %v478_v41  ;;  %v348_v9 = vcombine.high %v340_v46, %v340_v46  ;;  %v530_v17 = vcombine.low %v340_v46, %v347_v2 }
  0x26   :  { %v529_v12 = vcombine.low %v315_v57, %v316_v0  ;;  %v538_v19 = vrot.slane %v528_v11, %v2093_v35  ;;  %v125_v40 = vrot.slane %v123_v32, 1  ;;  %v133_v42 = vrot.slane %v1722_v21, 1 }
  0x27   :  { %v510_v4 = vrot.slane %v494_v60, %v2093_v35  ;;  %v503_v6 = vrot.slane %v493_v62, %v2093_v35  ;;  %v531_v18 = vcombine.low %v348_v9, %v372_v10  ;;  %v552_v22 = vrot.slane %v530_v17, %v2093_v35 }
  0x28   :  { %v545_v20 = vrot.slane %v529_v12, %v2093_v35  ;;  %v134_v43 = vrot.slane %v1723_v23, 1  ;;  %v119_v47 = vor.u32 %v118_v39, %v114_v29  ;;  %v126_v48 = vor.u32 %v125_v40, %v121_v31  ;;  %v1340_v31 = vld [vmem:[%s2450_s3 + $0x28] sm:$0xff] }
  0x29   :  { %v527_v14 = vcombine.low %v510_v4, %v524_v5  ;;  %v525_v15 = vcombine.low %v503_v6, %v517_v7  ;;  %v526_v16 = vcombine.high %v503_v6, %v517_v7  ;;  %v559_v26 = vrot.slane %v531_v18, %v2093_v35  ;;  %v1344_v39 = vld [vmem:[%s2450_s3 + $0x48] sm:$0xff] }
  0x2a   :  { %v561_v27 = vcombine.high %v538_v19, %v545_v20  ;;  %v560_v28 = vcombine.low %v538_v19, %v545_v20  ;;  %v379_v49 = vrot.slane %v365_v24, %v2093_v35  ;;  %v380_v52 = vcombine.high %v372_v10, %v372_v10  ;;  %v1335_v24 = vld [vmem:[%s2450_s3] sm:$0xff] }
  0x2b   :  { %877 = vmatprep.mubr.bf16.mxu0 %v527_v14  ;;  %1828 = vmatmul.mubr.bf16.vlgmr.msra.gmra.mrb[0].mxu1 %v526_v16  ;;  %v563_v33 = vcombine.high %v552_v22, %v559_v26  ;;  %v562_v37 = vcombine.low %v552_v22, %v559_v26  ;;  %v381_v41 = vcombine.low %v45_v8, %v119_v47  ;;  %v1940_v23 = vmov 0.0|0.0   ;;  %v1337_v26 = vld [vmem:[%s2450_s3 + $0x10] sm:$0xff]  ;;  %v1348_v47 = vld [vmem:[%s2450_s3 + $0x68] sm:$0xff] }
  0x2c   :  { %878 = vmatmul.mubr.bf16.vlgmr.msra.gmra.mrb[0].mxu0 %v525_v15  ;;  %1831 = vmatprep.mubr.msk.bf16.mxu1 %vm1938_vm0, %v1937_v1  ;;  %v577_v34 = vrot.slane %v561_v27, %v2093_v35  ;;  %v570_v38 = vrot.slane %v560_v28, %v2093_v35  ;;  %v395_v53 = vrot.slane %v133_v42, %v2093_v35  ;;  %v1338_v28 = vld [vmem:[%s2450_s3 + $0x18] sm:$0xff]  ;;  %v1345_v42 = vld [vmem:[%s2450_s3 + $0x50] sm:$0xff] }
  0x2d   :  { %v591_v44 = vrot.slane %v563_v33, %v2093_v35  ;;  %v584_v45 = vrot.slane %v562_v37, %v2093_v35  ;;  %v413_v54 = vcombine.low %v46_v13, %v126_v48  ;;  %v427_v55 = vrot.slane %v134_v43, %v2093_v35  ;;  %1854 = vmatprep.subr.bf16.mxu0 %v1940_v23  ;;  %v1341_v33 = vld [vmem:[%s2450_s3 + $0x30] sm:$0xff]  ;;  %v1346_v43 = vld [vmem:[%s2450_s3 + $0x58] sm:$0xff] }
  0x2e   :  { %v388_v56 = vrot.slane %v381_v41, %v2093_v35  ;;  %v595_v58 = vcombine.low %v379_v49, %v380_v52  ;;  %v1858_v29 = vpack.c.bf16 %v1338_v28, %v1337_v26  ;;  %v1861_v32 = vpack.c.bf16 %v1340_v31, %v1339_v30  ;;  %v1349_v49 = vld [vmem:[%s2450_s3 + $0x70] sm:$0xff]  ;;  %v1352_v52 = vld [vmem:[%s2450_s3 + $0x88] sm:$0xff] }
  0x2f   :  { %v594_v36 = vcombine.low %v577_v34, %v591_v44  ;;  %v592_v50 = vcombine.low %v570_v38, %v584_v45  ;;  %v593_v51 = vcombine.high %v570_v38, %v584_v45  ;;  %v420_v57 = vrot.slane %v413_v54, %v2093_v35  ;;  %v1342_v34 = vld [vmem:[%s2450_s3 + $0x38] sm:$0xff]  ;;  %v1343_v38 = vld [vmem:[%s2450_s3 + $0x40] sm:$0xff] }
  0x30   :  { %v396_v59 = vcombine.low %v388_v56, %v395_v53  ;;  %v397_v60 = vcombine.high %v388_v56, %v395_v53  ;;  %v605_v6 = vrot.slane %v595_v58, %v2093_v35  ;;  %v1864_v37 = vpack.c.bf16 %v1342_v34, %v1341_v33  ;;  %v1347_v45 = vld [vmem:[%s2450_s3 + $0x60] sm:$0xff]  ;;  %v1353_v53 = vld [vmem:[%s2450_s3 + $0x90] sm:$0xff]  ;;  %v1354_v54 = vld [vmem:[%s2450_s3 + $0x98] sm:$0xff] }
  0x31   :  { %885 = vmatprep.mubr.bf16.mxu0 %v594_v36  ;;  %v428_v61 = vcombine.low %v420_v57, %v427_v55  ;;  %v429_v62 = vcombine.high %v420_v57, %v427_v55  ;;  %v1867_v40 = vpack.c.bf16 %v1344_v39, %v1343_v38  ;;  %v1870_v44 = vpack.c.bf16 %v1346_v43, %v1345_v42  ;;  %v1350_v36 = vld [vmem:[%s2450_s3 + $0x78] sm:$0xff] }
  0x32   :  { %v404_v63 = vrot.slane %v396_v59, %v2093_v35  ;;  %v411_v0 = vrot.slane %v397_v60, %v2093_v35  ;;  %v1873_v48 = vpack.c.bf16 %v1348_v47, %v1347_v45  ;;  %v1882_v55 = vpack.c.bf16 %v1354_v54, %v1353_v53  ;;  %v1724_v60 = vld [vmem:[%s2451_s2] ss:$0 sm:$0xff] }
  0x33   :  { %1832 = vmatmul.mubr.bf16.gmra.mrb[4].mxu1 %v593_v51  ;;  %v436_v46 = vrot.slane %v428_v61, %v2093_v35  ;;  %v443_v2 = vrot.slane %v429_v62, %v2093_v35  ;;  %v1351_v51 = vld [vmem:[%s2450_s3 + $0x80] sm:$0xff]  ;;  %v1941_v56 = vmov 1983009808   ;;  %v445_v61 = vcombine.high %v1724_v60, %v1724_v60 }
  0x34   :  { %886 = vmatmul.mubr.bf16.gmra.mrb[4].mxu0 %v592_v50  ;;  %1835 = vmatprep.mubr.msk.bf16.mxu1 %vm1938_vm0, %v1937_v1  ;;  %v412_v3 = vcombine.high %v404_v63, %v404_v63  ;;  %v596_v5 = vcombine.low %v404_v63, %v411_v0  ;;  %v1876_v50 = vpack.c.bf16 %v1350_v36, %v1349_v49  ;;  %v447_v57 = vunpack.c.l.s4 %v1941_v56 }
  0x35   :  { %v444_v4 = vcombine.high %v436_v46, %v436_v46  ;;  %v1879_v41 = vpack.c.bf16 %v1352_v52, %v1351_v51 }
  0x36   :  { %v597_v7 = vcombine.low %v412_v3, %v436_v46  ;;  %v612_v9 = vrot.slane %v596_v5, %v2093_v35  ;;  %v448_v58 = vunpack.c.0.s8 %v447_v57 }
  0x37   :  { %v598_v8 = vcombine.low %v443_v2, %v444_v4 }
  0x38   :  { %v619_v10 = vrot.slane %v597_v7, %v2093_v35  ;;  %v628_v12 = vcombine.high %v605_v6, %v612_v9  ;;  %v627_v13 = vcombine.low %v605_v6, %v612_v9  ;;  %v2269_v59 = vsub.s32 %v448_v58, %v2071_v25 }
  0x39   :  { %v626_v11 = vrot.slane %v598_v8, %v2093_v35 }
  0x3a   :  { %v644_v15 = vrot.slane %v628_v12, %v2093_v35  ;;  %v637_v17 = vrot.slane %v627_v13, %v2093_v35  ;;  %v452_v62 = vrot.slane %v1724_v60, %v2269_v59  ;;  %v459_v63 = vrot.slane %v445_v61, %v2269_v59 }
  0x3b   :  { %v630_v14 = vcombine.high %v619_v10, %v626_v11  ;;  %v629_v16 = vcombine.low %v619_v10, %v626_v11 }
  0x3c   :  { %v460_v0 = vcombine.high %v452_v62, %v452_v62  ;;  %v816_v2 = vcombine.low %v459_v63, %v452_v62 }
  0x3d   :  { %v658_v18 = vrot.slane %v630_v14, %v2093_v35  ;;  %v651_v19 = vrot.slane %v629_v16, %v2093_v35  ;;  %v1336_v35 = vld [vmem:[%s2450_s3 + $0x8] sm:$0xff] }
  0x3e   :  { %v1855_v27 = vpack.c.bf16 %v1336_v35, %v1335_v24  ;;  %v815_v46 = vcombine.low %v452_v62, %v460_v0  ;;  %v832_v3 = vcombine.low %v460_v0, %v459_v63  ;;  %v830_v5 = vrot.slane %v816_v2, %v2269_v59 }
  0x3f   :  { %v661_v20 = vcombine.low %v644_v15, %v658_v18  ;;  %v659_v21 = vcombine.low %v637_v17, %v651_v19  ;;  %v660_v22 = vcombine.high %v637_v17, %v651_v19 }
  0x40   :  { %1856 = vmatpush1.bf16.msra.mxu0 %v1855_v27  ;;  %v823_v4 = vrot.slane %v815_v46, %v2269_v59  ;;  %v839_v6 = vrot.slane %v832_v3, %v2269_v59 }
  0x41   :  { %893 = vmatprep.mubr.bf16.mxu0 %v661_v20  ;;  %1836 = vmatmul.mubr.bf16.gmra.mrb[8].mxu1 %v660_v22  ;;  %v2288_v22 = vsub.s32 1, %v2071_v25 }
  0x42   :  { %894 = vmatmul.mubr.bf16.gmra.mrb[8].mxu0 %v659_v21  ;;  %1841 = vmatprep.mubr.msk.f32.mxu1 %vm1938_vm0, %v1937_v1  ;;  %v2279_v9 = vcombine.low %v823_v4, %v830_v5  ;;  %v2281_v15 = vcombine.low %v839_v6, %v823_v4  ;;  %v2285_v21 = vsub.s32 0, %v2071_v25  ;;  %v2292_v30 = vcombine.low %v830_v5, %v839_v6 }
  0x43   :  { %1857 = vmatprep.subr.bf16.mxu0 %v1940_v23 }
  0x44   :  { %1859 = vmatpush1.bf16.msra.mxu0 %v1858_v29 }
  0x45   :  { %1860 = vmatprep.subr.bf16.mxu0 %v1940_v23 }
  0x48   :  { %1862 = vmatpush1.bf16.msra.mxu0 %v1861_v32 }
  0x49   :  { %1863 = vmatprep.subr.bf16.mxu0 %v1940_v23 }
  0x4c   :  { %1865 = vmatpush1.bf16.msra.mxu0 %v1864_v37 }
  0x4d   :  { %1866 = vmatprep.subr.bf16.mxu0 %v1940_v23 }
  0x50   :  { %1868 = vmatpush1.bf16.msra.mxu0 %v1867_v40 }
  0x51   :  { %1869 = vmatprep.subr.bf16.mxu0 %v1940_v23 }
  0x54   :  { %1871 = vmatpush1.bf16.msra.mxu0 %v1870_v44 }
  0x55   :  { %1872 = vmatprep.subr.bf16.mxu0 %v1940_v23 }
  0x58   :  { %1874 = vmatpush1.bf16.msra.mxu0 %v1873_v48 }
  0x59   :  { %1875 = vmatprep.subr.bf16.mxu0 %v1940_v23 }
  0x5c   :  { %1877 = vmatpush1.bf16.msra.mxu0 %v1876_v50 }
  0x5d   :  { %1878 = vmatprep.subr.bf16.mxu0 %v1940_v23 }
  0x60   :  { %1880 = vmatpush1.bf16.msra.mxu0 %v1879_v41 }
  0x61   :  { %1881 = vmatprep.subr.bf16.mxu0 %v1940_v23 }
  0x64   :  { %1883 = vmatpush1.bf16.msra.mxu0 %v1882_v55 }
  0x65   :  { %1884 = vmatprep.subr.bf16.mxu0 %v1940_v23 }
  0xfe   :  { %v936_v7 = vpop.f32.mrb[0].mxu1 }
  0xff   :  { %v1776_v8 = vpop.f32.mrb[0].mxu0  ;;  %v1829_v10 = vpop.f32.mrb[1].mxu1 }
 0x100   :  { %v1777_v11 = vpop.f32.mrb[1].mxu0  ;;  %v939_v12 = vpop.f32.mrb[2].mxu1 }
 0x101   :  { %v1778_v13 = vadd.f32 %v1777_v11, %v1776_v8  ;;  %v1779_v14 = vpop.f32.mrb[2].mxu0  ;;  %v1830_v16 = vpop.f32.mrb[3].mxu1 }
 0x102   :  { %v1780_v17 = vpop.f32.mrb[3].mxu0 }
 0x103   :  { %v880_v18 = vadd.f32 %v1778_v13, %v2279_v9  ;;  %v1781_v19 = vadd.f32 %v1780_v17, %v1779_v14 }
 0x105   :  { %v937_v20 = vadd.f32 %v936_v7, %v880_v18  ;;  %v883_v24 = vadd.f32 %v1781_v19, %v2281_v15 }
 0x106   :  { %v944_v28 = vpop.f32.mrb[4].mxu1 }
 0x107   :  { %v965_v35 = vcombine.high %v937_v20, %v937_v20  ;;  %v972_v26 = vrot.slane %v937_v20, %v2269_v59  ;;  %v940_v27 = vadd.f32 %v939_v12, %v883_v24  ;;  %v1782_v29 = vpop.f32.mrb[4].mxu0  ;;  %v1833_v31 = vpop.f32.mrb[5].mxu1 }
 0x108   :  { %v1783_v37 = vpop.f32.mrb[5].mxu0  ;;  %v947_v38 = vpop.f32.mrb[6].mxu1 }
 0x109   :  { %v979_v32 = vrot.slane %v965_v35, %v2269_v59  ;;  %v980_v33 = vcombine.high %v972_v26, %v972_v26  ;;  %v1070_v34 = vrot.slane %v972_v26, %v2285_v21  ;;  %v1201_v25 = vrot.slane %v972_v26, %v2288_v22  ;;  %v1785_v43 = vpop.f32.mrb[6].mxu0  ;;  %v1834_v44 = vpop.f32.mrb[7].mxu1 }
 0x10a   :  { %v982_v39 = vcombine.high %v940_v27, %v940_v27  ;;  %v989_v40 = vrot.slane %v940_v27, %v2269_v59  ;;  %v1784_v42 = vadd.f32 %v1783_v37, %v1782_v29  ;;  %v1786_v36 = vpop.f32.mrb[7].mxu0 }
 0x10b   :  { %v981_v45 = vcombine.high %v979_v32, %v979_v32  ;;  %v1117_v47 = vrot.slane %v980_v33, %v2285_v21  ;;  %v1159_v48 = vrot.slane %v979_v32, %v2285_v21  ;;  %v1241_v49 = vrot.slane %v980_v33, %v2288_v22 }
 0x10c   :  { %v1285_v50 = vrot.slane %v979_v32, %v2288_v22  ;;  %v996_v51 = vrot.slane %v982_v39, %v2269_v59  ;;  %v997_v52 = vcombine.high %v989_v40, %v989_v40  ;;  %v1121_v41 = vrot.slane %v989_v40, %v2285_v21 }
 0x10d   :  { %v1074_v53 = vrot.slane %v981_v45, %v2285_v21  ;;  %v1205_v54 = vrot.slane %v981_v45, %v2288_v22  ;;  %v1245_v55 = vrot.slane %v989_v40, %v2288_v22  ;;  %v888_v56 = vadd.f32 %v1784_v42, %v2292_v30 }
 0x10e   :  { %v998_v57 = vcombine.high %v996_v51, %v996_v51  ;;  %v1078_v58 = vrot.slane %v996_v51, %v2285_v21  ;;  %v1146_v60 = vsel %vm1099_vm1, %v1121_v41, %v1117_v47  ;;  %v1163_v61 = vrot.slane %v997_v52, %v2285_v21 }
 0x10f   :  { %v1100_v62 = vsel %vm1099_vm1, %v1074_v53, %v1070_v34  ;;  %v1230_v63 = vsel %vm1101_vm2, %v1205_v54, %v1201_v25  ;;  %v1209_v0 = vrot.slane %v996_v51, %v2288_v22  ;;  %v1270_v46 = vsel %vm1101_vm2, %v1245_v55, %v1241_v49 }
 0x110   :  { %v1102_v2 = vsel %vm1101_vm2, %v1078_v58, %v1100_v62  ;;  %v1125_v3 = vrot.slane %v998_v57, %v2285_v21  ;;  %v1188_v4 = vsel %vm1099_vm1, %v1163_v61, %v1159_v48  ;;  %v1249_v5 = vrot.slane %v998_v57, %v2288_v22 }
 0x111   :  { %v1231_v6 = vsel %vm1103_vm3, %v1209_v0, %v1230_v63  ;;  %v1289_v7 = vrot.slane %v997_v52, %v2288_v22  ;;  %v945_v8 = vadd.f32 %v944_v28, %v888_v56  ;;  %v1787_v10 = vadd.f32 %v1786_v36, %v1785_v43 }
 0x112   :  { %v1271_v11 = vsel %vm1103_vm3, %v1249_v5, %v1270_v46  ;;  %v1147_v12 = vsel %vm1101_vm2, %v1125_v3, %v1146_v60 }
 0x113   :  { %v1314_v13 = vsel %vm1101_vm2, %v1289_v7, %v1285_v50  ;;  %v999_v14 = vcombine.high %v945_v8, %v945_v8  ;;  %v1006_v16 = vrot.slane %v945_v8, %v2269_v59  ;;  %v891_v17 = vadd.f32 %v1787_v10, %v2279_v9 }
 0x114   :  { %v952_v42 = vpop.f32.mrb[8].mxu1 }
 0x115   :  { %v1013_v18 = vrot.slane %v999_v14, %v2269_v59  ;;  %v1014_v19 = vcombine.high %v1006_v16, %v1006_v16  ;;  %v1167_v20 = vrot.slane %v1006_v16, %v2285_v21  ;;  %v1293_v24 = vrot.slane %v1006_v16, %v2288_v22  ;;  %v1788_v36 = vpop.f32.mrb[8].mxu0  ;;  %v1837_v50 = vpop.f32.mrb[9].mxu1  ;;  %v1355_v14 = vld [vmem:[%s2450_s3 + $0xa0] sm:$0xff] }
 0x116   :  { %v948_v35 = vadd.f32 %v947_v38, %v891_v17  ;;  %v1789_v54 = vpop.f32.mrb[9].mxu0  ;;  %v955_v55 = vpop.f32.mrb[10].mxu1 }
 0x117   :  { %v1015_v26 = vcombine.high %v1013_v18, %v1013_v18  ;;  %v1082_v27 = vrot.slane %v1014_v19, %v2285_v21  ;;  %v1129_v28 = vrot.slane %v1013_v18, %v2285_v21  ;;  %v1189_v29 = vsel %vm1101_vm2, %v1167_v20, %v1188_v4  ;;  %v1791_v60 = vpop.f32.mrb[10].mxu0  ;;  %v1838_v61 = vpop.f32.mrb[11].mxu1 }
 0x118   :  { %v1213_v9 = vrot.slane %v1014_v19, %v2288_v22  ;;  %v1253_v31 = vrot.slane %v1013_v18, %v2288_v22  ;;  %v1315_v32 = vsel %vm1103_vm3, %v1293_v24, %v1314_v13  ;;  %v1016_v33 = vcombine.high %v948_v35, %v948_v35  ;;  %v1792_v3 = vpop.f32.mrb[11].mxu0 }
 0x119   :  { %v1171_v34 = vrot.slane %v1015_v26, %v2285_v21  ;;  %v1297_v25 = vrot.slane %v1015_v26, %v2288_v22  ;;  %v1023_v37 = vrot.slane %v948_v35, %v2269_v59  ;;  %v1148_v38 = vsel %vm1103_vm3, %v1129_v28, %v1147_v12 }
 0x11a   :  { %v1232_v39 = vsel %vm1105_vm4, %v1213_v9, %v1231_v6  ;;  %v1030_v40 = vrot.slane %v1016_v33, %v2269_v59  ;;  %v1272_v43 = vsel %vm1105_vm4, %v1253_v31, %v1271_v11  ;;  %v1104_v44 = vsel %vm1103_vm3, %v1082_v27, %v1102_v2 }
 0x11b   :  { %v1190_v45 = vsel %vm1103_vm3, %v1171_v34, %v1189_v29  ;;  %v1316_v47 = vsel %vm1105_vm4, %v1297_v25, %v1315_v32  ;;  %v1031_v48 = vcombine.high %v1023_v37, %v1023_v37  ;;  %v1086_v49 = vrot.slane %v1023_v37, %v2285_v21 }
 0x11c   :  { %v1032_v51 = vcombine.high %v1030_v40, %v1030_v40  ;;  %v1175_v52 = vrot.slane %v1030_v40, %v2285_v21  ;;  %v1217_v41 = vrot.slane %v1023_v37, %v2288_v22  ;;  %v1301_v53 = vrot.slane %v1030_v40, %v2288_v22 }
 0x11d   :  { %v1133_v56 = vrot.slane %v1031_v48, %v2285_v21  ;;  %v1257_v57 = vrot.slane %v1031_v48, %v2288_v22  ;;  %v1790_v58 = vadd.f32 %v1789_v54, %v1788_v36  ;;  %v1106_v62 = vsel %vm1105_vm4, %v1086_v49, %v1104_v44 }
 0x11e   :  { %v1090_v63 = vrot.slane %v1032_v51, %v2285_v21  ;;  %v1191_v0 = vsel %vm1105_vm4, %v1175_v52, %v1190_v45  ;;  %v1221_v46 = vrot.slane %v1032_v51, %v2288_v22  ;;  %v1233_v2 = vsel %vm1107_vm5, %v1217_v41, %v1232_v39  ;;  %v1357_v52 = vld [vmem:[%s2450_s3 + $0xb0] sm:$0xff]  ;;  %v1358_v41 = vld [vmem:[%s2450_s3 + $0xb8] sm:$0xff] }
 0x11f   :  { %v1317_v4 = vsel %vm1107_vm5, %v1301_v53, %v1316_v47  ;;  %v896_v5 = vadd.f32 %v1790_v58, %v2281_v15  ;;  %v1793_v6 = vadd.f32 %v1792_v3, %v1791_v60  ;;  %v1273_v7 = vsel %vm1107_vm5, %v1257_v57, %v1272_v43  ;;  %v1356_v15 = vld [vmem:[%s2450_s3 + $0xa8] sm:$0xff]  ;;  %s1942_s3 = smov 64  }
 0x120   :  { %v1149_v8 = vsel %vm1105_vm4, %v1133_v56, %v1148_v38  ;;  %v1234_v10 = vsel %vm1109_vm6, %v1221_v46, %v1233_v2  ;;  %v1108_v11 = vsel %vm1107_vm5, %v1090_v63, %v1106_v62  ;;  %v1885_v19 = vpack.c.bf16 %v1356_v15, %v1355_v14  ;;  %v1440_v56 = vld [vmem:[%s2452_s5] sm:$0xf] }
 0x121   :  { %v953_v12 = vadd.f32 %v952_v42, %v896_v5  ;;  %v899_v13 = vadd.f32 %v1793_v6, %v2292_v30  ;;  %v1888_v63 = vpack.c.bf16 %v1358_v41, %v1357_v52  ;;  %1840 = vmatpush3.msk.msra.mxu1 %vm1452_vm9, %v1440_v56  ;;  %v1749_v14 = vld [vmem:[%s2453_s4] ss:$0 sm:$0xff] }
 0x122   :  { %1886 = vmatpush1.bf16.msra.mxu0 %v1885_v19  ;;  %1844 = vmatprep.subr.mxu1 %v1937_v1  ;;  %v1527_v19 = vld [vmem:[%s2454_s7] sm:$0x7] }
 0x123   :  { %v1033_v16 = vcombine.high %v953_v12, %v953_v12  ;;  %v1040_v17 = vrot.slane %v953_v12, %v2269_v59  ;;  %v956_v18 = vadd.f32 %v955_v55, %v899_v13  ;;  %1887 = vmatprep.subr.bf16.mxu0 %v1940_v23 }
 0x125   :  { %v1047_v20 = vrot.slane %v1033_v16, %v2269_v59  ;;  %v1048_v24 = vcombine.high %v1040_v17, %v1040_v17  ;;  %v1137_v35 = vrot.slane %v1040_v17, %v2285_v21  ;;  %v1261_v30 = vrot.slane %v1040_v17, %v2288_v22 }
 0x126   :  { %v1050_v26 = vcombine.high %v956_v18, %v956_v18  ;;  %v1057_v27 = vrot.slane %v956_v18, %v2269_v59  ;;  %1889 = vmatpush1.bf16.msra.mxu0 %v1888_v63 }
 0x127   :  { %v1094_v28 = vrot.slane %v1047_v20, %v2285_v21  ;;  %v1179_v29 = vrot.slane %v1048_v24, %v2285_v21  ;;  %v1225_v9 = vrot.slane %v1047_v20, %v2288_v22  ;;  %v1305_v31 = vrot.slane %v1048_v24, %v2288_v22 }
 0x128   :  { %v1064_v32 = vrot.slane %v1050_v26, %v2269_v59  ;;  %v1065_v33 = vcombine.high %v1057_v27, %v1057_v27  ;;  %v1183_v34 = vrot.slane %v1057_v27, %v2285_v21  ;;  %v1309_v25 = vrot.slane %v1057_v27, %v2288_v22  ;;  %v1614_v27 = vld [vmem:[%s2456_s9] sm:$0x7] }
 0x129   :  { %v1318_v37 = vsel %vm1109_vm6, %v1305_v31, %v1317_v4  ;;  %v1049_v38 = vcombine.high %v1047_v20, %v1047_v20  ;;  %v1274_v23 = vsel %vm1109_vm6, %v1261_v30, %v1273_v7  ;;  %v1150_v39 = vsel %vm1107_vm5, %v1137_v35, %v1149_v8  ;;  %v1751_v20 = vld [vmem:[%s2455_s6] ss:$0 sm:$0xff] }
 0x12a   :  { %v1066_v40 = vcombine.high %v1064_v32, %v1064_v32  ;;  %v1229_v42 = vrot.slane %v1065_v33, %v2288_v22  ;;  %v1319_v43 = vsel %vm1111_vm7, %v1309_v25, %v1318_v37  ;;  %v1269_v44 = vrot.slane %v1064_v32, %v2288_v22 }
 0x12b   :  { %v1328_v59 = vrot.slane %v1319_v43, 1  ;;  %v1265_v45 = vrot.slane %v1049_v38, %v2288_v22  ;;  %v1141_v47 = vrot.slane %v1049_v38, %v2285_v21  ;;  %v1145_v48 = vrot.slane %v1064_v32, %v2285_v21 }
 0x12c   :  { %v1187_v49 = vrot.slane %v1066_v40, %v2285_v21  ;;  %v1313_v36 = vrot.slane %v1066_v40, %v2288_v22  ;;  %v1192_v50 = vsel %vm1107_vm5, %v1179_v29, %v1191_v0  ;;  %v1235_v51 = vsel %vm1111_vm7, %v1225_v9, %v1234_v10 }
 0x12d   :  { %v1275_v53 = vsel %vm1111_vm7, %v1265_v45, %v1274_v23  ;;  %v1151_v54 = vsel %vm1109_vm6, %v1141_v47, %v1150_v39  ;;  %v1193_v55 = vsel %vm1109_vm6, %v1183_v34, %v1192_v50  ;;  %v1098_v22 = vrot.slane %v1065_v33, %v2285_v21  ;;  %v1757_v33 = vld [vmem:[%s2458_s10] ss:$0 sm:$0xff] }
 0x12e   :  { %v1329_v57 = vrot.slane %v1313_v36, 1  ;;  %v1896_v58 = vpack.i.bf16 %v1269_v44, %v1275_v53  ;;  %v1152_v60 = vsel %vm1111_vm7, %v1145_v48, %v1151_v54  ;;  %v1194_v61 = vsel %vm1111_vm7, %v1187_v49, %v1193_v55 }
 0x12f   :  { %v1110_v62 = vsel %vm1109_vm6, %v1094_v28, %v1108_v11  ;;  %v1754_v28 = vld [vmem:[%s2457_s8] ss:$0 sm:$0xff] }
 0x130   :  { %1897 = vrot.lane.b32.xlu0 %v1896_v58, %s1942_s3  ;;  %v1330_v0 = vsel %vm1324_vm8, %v1328_v59, %v1329_v57  ;;  %v1112_v21 = vsel %vm1111_vm7, %v1098_v22, %v1110_v62 }
 0x131   :  { %v1334_v46 = vmax.f32 %v1194_v61, %v1330_v0 }
 0x133   :  { %1750 = vmatprep.mubr.msk.f32.mxu0 %vm1196_vm10, %v1334_v46 }
 0x134   :  { %1153 = vrot.lane.b32.xlu0 %v1152_v60, %s1942_s3 }
 0x1a2   :  { %v1898_v2 = vpop.permute.xlu0 %1897 }
 0x1a3   :  { %v1900_v3 = vunpack.i.h.bf16 %v1898_v2  ;;  %v1899_v4 = vunpack.i.l.bf16 %v1898_v2 }
 0x1a5   :  { %v1321_v5 = vsel %vm1196_vm10, %v1229_v42, %v1900_v3  ;;  %v1320_v6 = vsel %vm1196_vm10, %v1235_v51, %v1899_v4 }
 0x1a6   :  { %v1326_v7 = vrot.slane %v1321_v5, 1  ;;  %v1325_v8 = vrot.slane %v1320_v6, 1  ;;  %v1154_v10 = vpop.permute.xlu0 %1153 }
 0x1a7   :  { %v1197_v11 = vsel %vm1196_vm10, %v1112_v21, %v1154_v10 }
 0x1a8   :  { %v1327_v12 = vsel %vm1324_vm8, %v1325_v8, %v1326_v7 }
 0x1a9   :  { %v1333_v13 = vmax.f32 %v1197_v11, %v1327_v12 }
 0x1ab   :  { %1434 = vmatmul.mubr.f32.vlgmr.msra.gmra.mrb[12].mxu0 %v1333_v13 }
 0x27e   :  { %v1435_v15 = vpop.f32.mrb[12].mxu0 }
 0x27f   :  { %v1436_v16 = vadd.f32 %v1749_v14, %v1435_v15  ;;  %v1437_v17 = vpop.f32.mrb[13].mxu0 }
 0x281   :  { %v1439_v18 = vmax.f32 %v1436_v16, 0.0 }
 0x283   :  { %1842 = vmatmul.mubr.msk.f32.vlgmr.msra.gmra.mrb[12].mxu1 %vm1448_vm11, %v1439_v18 }
 0x284   :  { %1846 = vmatprep.mubr.msk.f32.mxu1 %vm1938_vm0, %v1937_v1  ;;  %1845 = vmatpush3.msk.msra.mxu1 %vm1539_vm12, %v1527_v19 }
 0x285   :  { %1849 = vmatprep.subr.mxu1 %v1937_v1 }
 0x356   :  { %v1522_v24 = vpop.f32.mrb[12].mxu1 }
 0x357   :  { %v1523_v35 = vadd.f32 %v1751_v20, %v1522_v24  ;;  %v1843_v30 = vpop.f32.mrb[13].mxu1 }
 0x359   :  { %v1526_v26 = vmax.f32 %v1523_v35, 0.0 }
 0x35b   :  { %1847 = vmatmul.mubr.msk.f32.vlgmr.msra.gmra.mrb[14].mxu1 %vm1535_vm13, %v1526_v26 }
 0x35c   :  { %1851 = vmatprep.mubr.msk.f32.mxu1 %vm1938_vm0, %v1937_v1  ;;  %1850 = vmatpush3.msk.msra.mxu1 %vm1539_vm12, %v1614_v27 }
 0x42e   :  { %v1609_v29 = vpop.f32.mrb[14].mxu1 }
 0x42f   :  { %v1610_v9 = vadd.f32 %v1754_v28, %v1609_v29  ;;  %v1848_v31 = vpop.f32.mrb[15].mxu1 }
 0x431   :  { %v1613_v32 = vmax.f32 %v1610_v9, 0.0 }
 0x433   :  { %1852 = vmatmul.mubr.msk.f32.vlgmr.msra.gmra.mrb[16].mxu1 %vm1535_vm13, %v1613_v32 }
 0x506   :  { %v1694_v34 = vpop.f32.mrb[16].mxu1 }
 0x507   :  { %v1695_v1 = vadd.f32 %v1757_v33, %v1694_v34  ;;  %v1853_v25 = vpop.f32.mrb[17].mxu1 }
 0x509   :  { %v1699_v37 = vsel %vm1698_vm14, %v1695_v1, -inf }
 0x50a   :  { %1700 = vmax.xlane.f32.xlu1 %v1699_v37 }
 0x597   :  { %v1701_v38 = vpop.xlane.xlu1 %1700 }
 0x598   :  { %v1702_v23 = vsub.f32 %v1695_v1, %v1701_v38 }
 0x59a   :  { %v1703_v39 = vmul.f32 1.442695, %v1702_v23 }
 0x59c   :  { %1933 = vpow2.f32 %v1703_v39 }
 0x5a6   :  { %v1934_v40 = vpop.eup %1933 }
 0x5a7   :  { %v1705_v42 = vsel %vm1698_vm14, %v1934_v40, 0.0 }
 0x5a8   :  { %1706 = vadd.xlane.f32.xlu1 %v1705_v42 }
 0x635   :  { %v1707_v43 = vpop.xlane.xlu1 %1706 }
 0x636   :  { %1935 = vlog2.f32 %v1707_v43 }
 0x640   :  { %v1936_v44 = vpop.eup %1935 }
 0x641   :  { %v1709_v59 = vmul.f32 0.6931472, %v1936_v44 }
 0x643   :  { %v1710_v45 = vsub.f32 %v1702_v23, %v1709_v59 }
 0x645   :  { %1711 = vst.msk [vmem:[%s2459_s11] sm:$0xff] %vm1698_vm14, %v1710_v45 }

</bundles_post_ra>
